<compile_context>
chip_gen: v7x
topology: tpu7x:2x2x1
jax: 0.10.0
libtpu: 0.0.40
codegen_flags: <defaults>
</compile_context>

<pallas_src>
import functools

import jax
import jax.numpy as jnp
from jax.experimental import pallas as pl
from jax.experimental.pallas import tpu as pltpu


def _round_up(x, m):
    return ((x + m - 1) // m) * m


def _static_pow(x, gamma):
    """x**gamma with a VPU-only fast path for static non-negative integer gamma."""
    g = float(gamma)
    if g.is_integer() and g >= 0:
        n = int(g)
        if n == 0:
            return jnp.ones_like(x)
        acc = None
        base = x
        while n:
            if n & 1:
                acc = base if acc is None else acc * base
            n >>= 1
            if n:
                base = base * base
        return acc
    # Non-integer gamma: exp(gamma * log(x)) on the EUP (x is clamped >= 0).
    return jnp.power(x, g)


def _focal_loss_kernel(x_ref, tgt_ref, w_ref, out_ref, *, gamma, lane_dense):
    x = x_ref[...].astype(jnp.float32)      # [bn, C] logits
    tgt = tgt_ref[...]                      # [bn, 1] int32 targets
    w = w_ref[...].astype(jnp.float32)      # [1, C]  class weights
    bn, C = x.shape

    # Numerically stable softmax statistics over the full tile: this is the
    # unavoidable per-element work (subtract, exp) plus two cross-lane reduces.
    m = jnp.max(x, axis=-1, keepdims=True)                    # [bn, 1]
    shifted = x - m                                           # [bn, C]
    s = jnp.sum(jnp.exp(shifted), axis=-1, keepdims=True)     # [bn, 1]

    # Gather the target column FIRST (compare + select + cross-lane sum on the
    # otherwise-idle XLU); all focal math below is on [bn, 1] only.
    col = jax.lax.broadcasted_iota(jnp.int32, (bn, C), 1)
    is_tgt = col == tgt                                               # [bn, C]
    x_t = jnp.sum(jnp.where(is_tgt, shifted, 0.0), axis=-1, keepdims=True)
    w_t = jnp.sum(jnp.where(is_tgt, w, 0.0), axis=-1, keepdims=True)

    logpt_t = x_t - jnp.log(s)                    # [bn, 1] log_softmax @ target
    pt_t = jnp.exp(logpt_t)                       # [bn, 1] matches torch exp(logpt)
    one_minus_pt = jnp.maximum(1.0 - pt_t, 0.0)   # guard pow() for non-int gamma
    loss = -w_t * (_static_pow(one_minus_pt, gamma) * logpt_t)   # [bn, 1]

    if lane_dense:
        # Put per-row losses on the lane axis so stores are full-lane vst into
        # a (1, block_n) slab instead of 1-of-128 masked vst.msk.
        out_ref[...] = jnp.transpose(loss)        # [1, bn]
    else:
        out_ref[...] = loss                       # [bn, 1]


def _pallas_focal_loss(x, tgt2d, w2d, gamma, block_n, lane_dense, vmem_limit):
    padded_n, C = x.shape
    num_blocks = padded_n // block_n
    kernel = functools.partial(
        _focal_loss_kernel, gamma=float(gamma), lane_dense=lane_dense)

    if lane_dense:
        out_shape = jax.ShapeDtypeStruct((1, padded_n), jnp.float32)
        out_spec = pl.BlockSpec((1, block_n), lambda i: (0, i))
    else:
        out_shape = jax.ShapeDtypeStruct((padded_n, 1), jnp.float32)
        out_spec = pl.BlockSpec((block_n, 1), lambda i: (i, 0))

    out = pl.pallas_call(
        kernel,
        out_shape=out_shape,
        grid_spec=pltpu.PrefetchScalarGridSpec(
            num_scalar_prefetch=0,
            grid=(num_blocks,),
            in_specs=[
                pl.BlockSpec((block_n, C), lambda i: (i, 0)),  # logits tile
                pl.BlockSpec((block_n, 1), lambda i: (i, 0)),  # targets tile
                pl.BlockSpec((1, C), lambda i: (0, 0)),        # class weights
            ],
            out_specs=out_spec,
        ),
        compiler_params=pltpu.CompilerParams(
            dimension_semantics=("parallel",),   # shards grid across v7x's 2 TCs
            vmem_limit_bytes=vmem_limit),
    )(x, tgt2d, w2d)
    return out.reshape(padded_n)


def focal_loss(x, target, weight=None, gamma=2.0, target_tile_bytes=4 << 20):
    """x: [N, C] float (f32 or bf16), target: [N] int, weight: optional [C].

    Returns the per-sample focal loss, shape [N], float32.
    """
    N, C = x.shape
    itemsize = jnp.dtype(x.dtype).itemsize
    c_pad = _round_up(C, 128)

    if weight is None:
        weight = jnp.ones((C,), jnp.float32)
    w2d = jnp.asarray(weight, jnp.float32).reshape(1, C)
    tgt = jnp.asarray(target, jnp.int32)

    # ---- tile sizing (all static at trace time) ----------------------------
    # Padded VMEM bytes of ONE pipeline buffer per row: lane-padded logits row
    # (dtype itemsize) + the lane-padded int32 targets row.
    row_bytes = itemsize * c_pad + 4 * 128
    rows = max(8, target_tile_bytes // row_bytes)

    # Lane-dense (1, bn) output requires bn % 128 == 0; for huge C (fewer than
    # 128 rows fit the budget) fall back to a (bn, 1) output where bn only has
    # to be a multiple of 8 -- output bytes are negligible vs input bytes there.
    lane_dense = rows >= 128
    gran = 128 if lane_dense else 8

    block_n = max(gran, (rows // gran) * gran)
    n_pad = _round_up(N, gran)
    block_n = min(block_n, n_pad)
    # Keep >= 2 grid blocks whenever N allows so the "parallel" axis can shard
    # across v7x's two TensorCores (no effect on single-TC v5e/v6e).
    if n_pad >= 2 * gran:
        block_n = min(block_n, max(gran, ((n_pad // 2) // gran) * gran))

    padded_n = _round_up(N, block_n)
    if padded_n != N:
        x = jnp.pad(x, ((0, padded_n - N), (0, 0)))
        tgt = jnp.pad(tgt, (0, padded_n - N))
    tgt2d = tgt.reshape(padded_n, 1)

    # ---- explicit scoped-VMEM budget (double-buffered, padded shapes) ------
    out_tile_bytes = (8 * block_n * 4) if lane_dense else (block_n * 128 * 4)
    vmem_need = (2 * block_n * c_pad * itemsize      # logits, 2 pipeline buffers
                 + 2 * block_n * 128 * 4             # targets (lane-padded int32)
                 + 2 * 8 * c_pad * 4                 # weights (sublane-padded f32)
                 + 2 * out_tile_bytes)               # output
    # +50% headroom, floor comfortably above defaults-needed, cap well under
    # v7x's 64 MiB physical VMEM.
    vmem_limit = int(min(max(vmem_need + vmem_need // 2 + (2 << 20), 24 << 20),
                         56 << 20))

    out = _pallas_focal_loss(x, tgt2d, w2d, gamma, block_n, lane_dense, vmem_limit)
    return out[:N]


def _focal_loss_ref(x, target, weight, gamma):
    """Pure-JAX reference matching the PyTorch module."""
    logpt = jax.nn.log_softmax(x.astype(jnp.float32), axis=1)
    pt = jnp.exp(logpt)
    logpt = (1.0 - pt) ** gamma * logpt
    picked = jnp.take_along_axis(logpt, target[:, None], axis=1)[:, 0]
    return -weight[target] * picked


if __name__ == "__main__":
    key = jax.random.PRNGKey(0)
    kx, kt = jax.random.split(key)

    N, C = 200, 10          # exercises padding (200 -> 256) and a 2-block grid
    gamma = 2.0

    x = jax.random.normal(kx, (N, C), dtype=jnp.float32)
    target = jax.random.randint(kt, (N,), 0, C, dtype=jnp.int32)
    # deterministic per-class weights (module's optional `weight` parameter)
    weight = jnp.linspace(0.5, 1.5, C, dtype=jnp.float32)

    loss = focal_loss(x, target, weight=weight, gamma=gamma)
    loss = jax.block_until_ready(loss)

    ref = _focal_loss_ref(x, target, weight, gamma)
    assert loss.shape == (N,)
    assert jnp.allclose(loss, ref, atol=1e-5, rtol=1e-5), (loss, ref)

    print("KERNEL_OK")
</pallas_src>

<mosaic_0001>
module attributes {stable_mosaic.version = 11 : i64} {
  func.func @_focal_loss_kernel(%arg0: i32, %arg1: memref<128x10xf32, #tpu.memory_space<vmem>>, %arg2: memref<128x1xi32, #tpu.memory_space<vmem>>, %arg3: memref<1x10xf32, #tpu.memory_space<vmem>>, %arg4: memref<1x128xf32, #tpu.memory_space<vmem>>) attributes {dimension_semantics = [#tpu.dimension_semantics<parallel>], iteration_bounds = array<i64: 2>, scalar_prefetch = 0 : i64, scratch_operands = 0 : i64, tpu.core_type = #tpu.core_type<tc>, window_params = [{transform_indices = @transform_0, window_bounds = array<i64: 128, 10>}, {transform_indices = @transform_1, window_bounds = array<i64: 128, 1>}, {pipeline_mode = #tpu.pipeline_mode<synchronous>, transform_indices = @transform_2, window_bounds = array<i64: 1, 10>}, {transform_indices = @transform_3, window_bounds = array<i64: 1, 128>}]} {
    %c0 = arith.constant 0 : index
    %c0_0 = arith.constant 0 : index
    %0 = vector.load %arg1[%c0, %c0_0] : memref<128x10xf32, #tpu.memory_space<vmem>>, vector<128x10xf32>
    %c0_1 = arith.constant 0 : index
    %c0_2 = arith.constant 0 : index
    %1 = vector.load %arg2[%c0_1, %c0_2] : memref<128x1xi32, #tpu.memory_space<vmem>>, vector<128x1xi32>
    %c0_3 = arith.constant 0 : index
    %c0_4 = arith.constant 0 : index
    %2 = vector.load %arg3[%c0_3, %c0_4] : memref<1x10xf32, #tpu.memory_space<vmem>>, vector<1x10xf32>
    %cst = arith.constant dense<0xFF800000> : vector<128xf32>
    %3 = vector.multi_reduction <maximumf>, %0, %cst [1] : vector<128x10xf32> to vector<128xf32>
    %4 = vector.shape_cast %3 : vector<128xf32> to vector<128x1xf32>
    %5 = vector.broadcast %4 : vector<128x1xf32> to vector<128x10xf32>
    %6 = arith.subf %0, %5 : vector<128x10xf32>
    %7 = math.exp %6 : vector<128x10xf32>
    %cst_5 = arith.constant dense<0.000000e+00> : vector<128xf32>
    %8 = vector.multi_reduction <add>, %7, %cst_5 [1] : vector<128x10xf32> to vector<128xf32>
    %9 = vector.shape_cast %8 : vector<128xf32> to vector<128x1xf32>
    %10 = tpu.iota {dimensions = array<i32: 1>} : vector<128x10xi32>
    %11 = vector.broadcast %1 : vector<128x1xi32> to vector<128x10xi32>
    %12 = arith.cmpi eq, %10, %11 : vector<128x10xi32>
    %cst_6 = arith.constant 0.000000e+00 : f32
    %13 = vector.broadcast %cst_6 : f32 to vector<128x10xf32>
    %14 = arith.select %12, %6, %13 : vector<128x10xi1>, vector<128x10xf32>
    %cst_7 = arith.constant dense<0.000000e+00> : vector<128xf32>
    %15 = vector.multi_reduction <add>, %14, %cst_7 [1] : vector<128x10xf32> to vector<128xf32>
    %16 = vector.shape_cast %15 : vector<128xf32> to vector<128x1xf32>
    %cst_8 = arith.constant 0.000000e+00 : f32
    %17 = vector.shape_cast %2 : vector<1x10xf32> to vector<1x10xf32>
    %18 = vector.broadcast %17 : vector<1x10xf32> to vector<128x10xf32>
    %19 = vector.broadcast %cst_8 : f32 to vector<128x10xf32>
    %20 = arith.select %12, %18, %19 : vector<128x10xi1>, vector<128x10xf32>
    %cst_9 = arith.constant dense<0.000000e+00> : vector<128xf32>
    %21 = vector.multi_reduction <add>, %20, %cst_9 [1] : vector<128x10xf32> to vector<128xf32>
    %22 = vector.shape_cast %21 : vector<128xf32> to vector<128x1xf32>
    %23 = math.log %9 : vector<128x1xf32>
    %24 = arith.subf %16, %23 : vector<128x1xf32>
    %25 = math.exp %24 : vector<128x1xf32>
    %cst_10 = arith.constant 1.000000e+00 : f32
    %26 = vector.broadcast %cst_10 : f32 to vector<128x1xf32>
    %27 = arith.subf %26, %25 : vector<128x1xf32>
    %cst_11 = arith.constant 0.000000e+00 : f32
    %28 = vector.broadcast %cst_11 : f32 to vector<128x1xf32>
    %29 = arith.maximumf %27, %28 : vector<128x1xf32>
    %cst_12 = arith.constant 0.000000e+00 : f32
    %30 = vector.broadcast %cst_12 : f32 to vector<128x1xf32>
    %31 = arith.subf %30, %22 : vector<128x1xf32>
    %32 = arith.mulf %29, %29 : vector<128x1xf32>
    %33 = arith.mulf %32, %24 : vector<128x1xf32>
    %34 = arith.mulf %31, %33 : vector<128x1xf32>
    %35 = tpu.transpose %34, [1, 0] : vector<128x1xf32> -> vector<1x128xf32>
    %c0_13 = arith.constant 0 : index
    %c0_14 = arith.constant 0 : index
    %36 = vector.load %arg4[%c0_13, %c0_14] : memref<1x128xf32, #tpu.memory_space<vmem>>, vector<1x128xf32>
    tpu.vector_store %arg4[%c0_13, %c0_14], %35 {strides = array<i32>} : memref<1x128xf32, #tpu.memory_space<vmem>>, vector<1x128xf32>,
    return
  }
  func.func @transform_0(%arg0: i32) -> (i32, i32) {
    %c0_i32 = arith.constant 0 : i32
    %c0_i32_0 = arith.constant 0 : i32
    return %arg0, %c0_i32 : i32, i32
  }
  func.func @transform_1(%arg0: i32) -> (i32, i32) {
    %c0_i32 = arith.constant 0 : i32
    %c0_i32_0 = arith.constant 0 : i32
    return %arg0, %c0_i32 : i32, i32
  }
  func.func @transform_2(%arg0: i32) -> (i32, i32) {
    %c0_i32 = arith.constant 0 : i32
    %c0_i32_0 = arith.constant 0 : i32
    %c0_i32_1 = arith.constant 0 : i32
    return %c0_i32, %c0_i32_0 : i32, i32
  }
  func.func @transform_3(%arg0: i32) -> (i32, i32) {
    %c0_i32 = arith.constant 0 : i32
    %c0_i32_0 = arith.constant 0 : i32
    return %c0_i32, %arg0 : i32, i32
  }
}

</mosaic_0001>

<bundles_post_ra>
// kernel: tpu_custom_call.1
= control target key start
LH: loop header
LB: loop body
LE: loop exit
PB: predicated region body
PF: predicated region fallthrough
CT: control target
= control target key end

     0   :  { %8 = vsyncpa [#allocation3], 0  ;;  %s1653_s0 = inlined_call_operand.vmem [shape: f32[256,10], index: 0, kind: input, shape index: {}]   ;;  %s1654_s1 = inlined_call_operand.vmem [shape: s32[256,1], index: 1, kind: input, shape index: {}]   ;;  %s1655_s2 = inlined_call_operand.vmem [shape: f32[1,10], index: 2, kind: input, shape index: {}]   ;;  %s1656_s3 = inlined_call_operand.hbm [shape: f32[1,256], index: 3, kind: output, shape index: {}]  }
   0x1   :  { %10 = vsyncpa [#allocation3 + $0x1], 0  ;;  %s1095_s12 = smov 0   ;;  %s1097_s13 = smov 0  }
   0x2   :  { %s1099_s14 = smov 0   ;;  %s1101_s15 = smov 0  }
   0x3 LB: > { %s858_s16 = sadd.s32 4294967295, %s1071_s15   ;;  %s859_s17 = sadd.s32 4294967294, %s1071_s15   ;;  %s1071_s15 = sphi %s1101_s15, %s1662_s15   ;;  %s1067_s14 = sphi %s1099_s14, %s1661_s14   ;;  %s1063_s13 = sphi %s1097_s13, %s1660_s13   ;;  %s1059_s12 = sphi %s1095_s12, %s1659_s12  }
   0x4   : > { %s1118_s18 = sadd.s32 1, %s1071_s15   ;;  %s96_s19 = sadd.s32 1, %s1067_s14 }
   0x5   : > { %s93_s20 = ssub.s32 %s1071_s15, %s1118_s18  ;;  %p106_p0 = scmp.ne.s32.totalorder %s1067_s14, %s1063_s13 }
   0x6   : > { %p94_p1 = scmp.eq.s32.totalorder %s93_s20, 0  ;;  %p107_p2 = scmp.eq.s32.totalorder %s858_s16, 1 }
   0x7   : > { %p112_p3 = scmp.ne.s32.totalorder %s1063_s13, %s1059_s12  ;;  %p113_p4 = scmp.eq.s32.totalorder %s859_s17, 1 }
   0x8   : > { %s1128_s21 = scalar_select %p94_p1, %s1067_s14, %s96_s19  }
   0x9   : > { %p1130_p5 = por %p107_p2, %p106_p0  ;;  %p1134_p6 = por %p113_p4, %p112_p3 }
   0xa   : > { %p862_p7 = scmp.ge.s32.totalorder %s1071_s15, 1  ;;  %p152_p8 = scmp.lt.s32.totalorder %s1071_s15, 3 }
   0xc   : > { %p153_p9 = pnand %p862_p7, %p152_p8 }
   0xd   : > { %s1140_s24 = sshll.u32 (!%p153_p9), %s858_s16, 4  ;;  %v1073_v0 = vmov (!%p153_p9), 0   ;;  %vm225_vm0 = vcmask (!%p153_p9), 80896   ;;  %v370_v63 = vlaneseq (!%p153_p9)  ;;  %s178_s8 = sand.u32 (!%p153_p9), 1, %s1063_s13  }
   0xe   : > { %156 = sbr.rel (%p153_p9) target bundleno = 551 (0x227), region = 32  ;;  %p181_p10 = scmp.lt.s32.totalorder (!%p153_p9), %s1140_s24, 31  ;;  %911 = vset.pattern.permute.xlu1 (!%p153_p9), %v1073_v0  ;;  %912 = vset.pattern.permute.xlu0 (!%p153_p9), %v1073_v0 }
   0xf   : > { %s179_s9 = scalar_lea.vmem (!%p153_p9), [#allocation2], %s178_s8  ;;  %s1613_s17 = scalar_lea.hbm (!%p153_p9), %s1656_s3, %s1140_s24 }
  0x10   : > { %s792_s10 = sshll.u32 (!%p153_p9), %s179_s9, 4  ;;  %s780_s19 = scalar_lea.sflag (!%p153_p9), [#allocation3], %s178_s8  ;;  %s1607_s10 = int_to_ptr.vmem [resolvable:$true] %s792_s10 }
  0x11   : > { %s1009_s20 = scalar_lea.vmem (!%p153_p9), %s1607_s10, 16 }
  0x12   : > { %p1010_p11 = scmp.ne.s32.totalorder (!%p153_p9), %s1607_s10, %s1009_s20 }
  0x14   : > { %p1011_p12 = pnand (!%p153_p9), %p1010_p11, %p1130_p5 }
  0x15   : > { %s1144_s25 = scalar_select %p181_p10, %s1140_s24, 31 }
  0x16   : > { %p1012_p13 = pneg %p1011_p12 }
  0x17   : > { %s864_s26 = sshll.u32 %s1144_s25, 3  ;;  %s1074_s25 = smov [#allocation2]  }
  0x18   : > { %s1152_s29 = scalar_lea.vmem %s1653_s0, %s864_s26  ;;  %s1239_s5 = scalar_lea.vmem %s1654_s1, %s864_s26 }
  0x19   : > { %v1155_v1 = vld [vmem:[%s1152_s29 + $0x10] sm:$0xff]  ;;  %v1158_v2 = vld [vmem:[%s1152_s29] sm:$0xff]  ;;  %v1161_v3 = vld [vmem:[%s1152_s29 + $0x18] sm:$0xff]  ;;  %s1013_s26 = sshll.u32 %s1074_s25, 4  ;;  %s1014_s26 = int_to_ptr.vmem [resolvable:$false] %s1013_s26 }
  0x1a   : > { %v232_v4 = vsel %vm225_vm0, %v1155_v1, -inf  ;;  %v226_v5 = vsel %vm225_vm0, %v1158_v2, -inf  ;;  %v1168_v6 = vld [vmem:[%s1152_s29 + $0x8] sm:$0xff]  ;;  %v235_v7 = vsel %vm225_vm0, %v1161_v3, -inf  ;;  %v1178_v10 = vld [vmem:[%s1152_s29 + $0x20] sm:$0xff]  ;;  %v1185_v13 = vld [vmem:[%s1152_s29 + $0x38] sm:$0xff]  ;;  %p1016_p0 = scmp.lt.s32.totalorder %s1607_s10, %s1014_s26 }
  0x1b   : > { %233 = vmax.xlane.f32.xlu1 %v232_v4  ;;  %227 = vmax.xlane.f32.xlu0 %v226_v5  ;;  %v229_v8 = vsel %vm225_vm0, %v1168_v6, -inf  ;;  %v1175_v9 = vld [vmem:[%s1152_s29 + $0x28] sm:$0xff]  ;;  %v238_v12 = vsel %vm225_vm0, %v1178_v10, -inf  ;;  %v1188_v14 = vld [vmem:[%s1152_s29 + $0x30] sm:$0xff]  ;;  %v247_v15 = vsel %vm225_vm0, %v1185_v13, -inf  ;;  %v1198_v18 = vld [vmem:[%s1152_s29 + $0x40] sm:$0xff] }
  0x1c   : > { %v241_v11 = vsel %vm225_vm0, %v1175_v9, -inf  ;;  %v244_v16 = vsel %vm225_vm0, %v1188_v14, -inf  ;;  %v1195_v17 = vld [vmem:[%s1152_s29 + $0x48] sm:$0xff]  ;;  %v250_v20 = vsel %vm225_vm0, %v1198_v18, -inf  ;;  %v1205_v21 = vld [vmem:[%s1152_s29 + $0x58] sm:$0xff]  ;;  %v1208_v22 = vld [vmem:[%s1152_s29 + $0x50] sm:$0xff] }
  0x1d   : > { %v253_v19 = vsel %vm225_vm0, %v1195_v17, -inf  ;;  %v259_v23 = vsel %vm225_vm0, %v1205_v21, -inf  ;;  %v256_v24 = vsel %vm225_vm0, %v1208_v22, -inf  ;;  %v1215_v25 = vld [vmem:[%s1152_s29 + $0x68] sm:$0xff]  ;;  %v1218_v26 = vld [vmem:[%s1152_s29 + $0x60] sm:$0xff]  ;;  %v1225_v29 = vld [vmem:[%s1152_s29 + $0x78] sm:$0xff] }
  0x1e   : > { %v265_v27 = vsel %vm225_vm0, %v1215_v25, -inf  ;;  %v262_v28 = vsel %vm225_vm0, %v1218_v26, -inf  ;;  %v1228_v30 = vld [vmem:[%s1152_s29 + $0x70] sm:$0xff]  ;;  %v271_v31 = vsel %vm225_vm0, %v1225_v29, -inf  ;;  %v208_v33 = vld [vmem:[%s1239_s5] sm:$0xff]  ;;  %v209_v35 = vld [vmem:[%s1239_s5 + $0x8] sm:$0xff] }
  0x1f   : > { %236 = vmax.xlane.f32.xlu1 %v235_v7  ;;  %230 = vmax.xlane.f32.xlu0 %v229_v8  ;;  %v268_v32 = vsel %vm225_vm0, %v1228_v30, -inf  ;;  %v210_v34 = vld [vmem:[%s1239_s5 + $0x10] sm:$0xff]  ;;  %v211_v36 = vld [vmem:[%s1239_s5 + $0x18] sm:$0xff]  ;;  %v212_v38 = vld [vmem:[%s1239_s5 + $0x20] sm:$0xff]  ;;  %s1015_s27 = scalar_lea.vmem %s1014_s26, 32 }
  0x20   : > { %v218_v37 = vld [vmem:[%s1239_s5 + $0x50] sm:$0xff]  ;;  %v220_v39 = vld [vmem:[%s1239_s5 + $0x60] sm:$0xff]  ;;  %v213_v40 = vld [vmem:[%s1239_s5 + $0x28] sm:$0xff]  ;;  %p1017_p1 = scmp.lt.s32.totalorder %s1015_s27, %s1009_s20 }
  0x21   : > { %v222_v41 = vld [vmem:[%s1239_s5 + $0x70] sm:$0xff]  ;;  %v215_v43 = vld [vmem:[%s1239_s5 + $0x38] sm:$0xff]  ;;  %v216_v44 = vld [vmem:[%s1239_s5 + $0x40] sm:$0xff] }
  0x22   : > { %v214_v42 = vld [vmem:[%s1239_s5 + $0x30] sm:$0xff]  ;;  %v217_v45 = vld [vmem:[%s1239_s5 + $0x48] sm:$0xff]  ;;  %v219_v46 = vld [vmem:[%s1239_s5 + $0x58] sm:$0xff]  ;;  %p1018_p2 = por %p1017_p1, %p1016_p0 }
  0x23   : > { %242 = vmax.xlane.f32.xlu1 %v241_v11  ;;  %239 = vmax.xlane.f32.xlu0 %v238_v12  ;;  %v221_v47 = vld [vmem:[%s1239_s5 + $0x68] sm:$0xff]  ;;  %v223_v48 = vld [vmem:[%s1239_s5 + $0x78] sm:$0xff]  ;;  %v1272_v11 = vand.u32 127, %v370_v63 }
  0x24   : > { %p1019_p3 = pnand %p1018_p2, %p1012_p13 }
  0x27   : > { %248 = vmax.xlane.f32.xlu1 %v247_v15  ;;  %245 = vmax.xlane.f32.xlu0 %v244_v16 }
  0x2b   : > { %254 = vmax.xlane.f32.xlu1 %v253_v19  ;;  %251 = vmax.xlane.f32.xlu0 %v250_v20 }
  0x2f   : > { %260 = vmax.xlane.f32.xlu1 %v259_v23  ;;  %257 = vmax.xlane.f32.xlu0 %v256_v24 }
  0x33   : > { %266 = vmax.xlane.f32.xlu1 %v265_v27  ;;  %263 = vmax.xlane.f32.xlu0 %v262_v28 }
  0x37   : > { %272 = vmax.xlane.f32.xlu1 %v271_v31  ;;  %269 = vmax.xlane.f32.xlu0 %v268_v32 }
  0x48   : > { %373 = vperm.xlu1 %911, %v208_v33  }
  0x4c   : > { %379 = vperm.xlu1 %911, %v210_v34  }
  0x4d   : > { %376 = vperm.xlu0 %912, %v209_v35  }
  0x50   : > { %382 = vperm.xlu1 %911, %v211_v36  }
  0x51   : > { %403 = vperm.xlu0 %912, %v218_v37  }
  0x54   : > { %385 = vperm.xlu1 %911, %v212_v38  }
  0x55   : > { %409 = vperm.xlu0 %912, %v220_v39  }
  0x58   : > { %388 = vperm.xlu1 %911, %v213_v40  }
  0x59   : > { %415 = vperm.xlu0 %912, %v222_v41  }
  0x5c   : > { %391 = vperm.xlu1 %911, %v214_v42  }
  0x60   : > { %394 = vperm.xlu1 %911, %v215_v43  }
  0x64   : > { %397 = vperm.xlu1 %911, %v216_v44  }
  0x68   : > { %400 = vperm.xlu1 %911, %v217_v45  }
  0x6c   : > { %406 = vperm.xlu1 %911, %v219_v46  }
  0x70   : > { %412 = vperm.xlu1 %911, %v221_v47  }
  0x74   : > { %418 = vperm.xlu1 %911, %v223_v48  }
  0xa8   : > { %v234_v49 = vpop.xlane.xlu1 %233  ;;  %v228_v50 = vpop.xlane.xlu0 %227 }
  0xa9   : > { %v274_v61 = vsub.f32 %v1158_v2, %v228_v50  ;;  %v276_v0 = vsub.f32 %v1155_v1, %v234_v49 }
  0xab   : > { %v290_v4 = vmul.f32 1.442695, %v274_v61  ;;  %v294_v12 = vmul.f32 1.442695, %v276_v0 }
  0xac   : > { %v237_v51 = vpop.xlane.xlu1 %236  ;;  %v231_v52 = vpop.xlane.xlu0 %230 }
  0xad   : > { %913 = vpow2.f32 %v290_v4  ;;  %v275_v20 = vsub.f32 %v1168_v6, %v231_v52  ;;  %v277_v34 = vsub.f32 %v1161_v3, %v237_v51 }
  0xae   : > { %915 = vpow2.f32 %v294_v12 }
  0xaf   : > { %v292_v41 = vmul.f32 1.442695, %v275_v20  ;;  %v296_v49 = vmul.f32 1.442695, %v277_v34 }
  0xb0   : > { %v1257_v53 = vpop.xlane.xlu1 %242  ;;  %v240_v54 = vpop.xlane.xlu0 %239 }
  0xb1   : > { %v278_v8 = vsub.f32 %v1178_v10, %v240_v54  ;;  %v279_v47 = vsub.f32 %v1175_v9, %v1257_v53 }
  0xb3   : > { %v298_v2 = vmul.f32 1.442695, %v278_v8 }
  0xb4   : > { %v1259_v55 = vpop.xlane.xlu1 %248  ;;  %v246_v56 = vpop.xlane.xlu0 %245 }
  0xb5   : > { %v1281_v1 = vsub.f32 %v1188_v14, %v246_v56  ;;  %917 = vpow2.f32 %v298_v2  ;;  %v300_v56 = vmul.f32 1.442695, %v279_v47 }
  0xb7   : > { %v302_v14 = vmul.f32 1.442695, %v1281_v1  ;;  %v914_v33 = vpop.eup %913 }
  0xb8   : > { %v255_v57 = vpop.xlane.xlu1 %254  ;;  %v252_v58 = vpop.xlane.xlu0 %251  ;;  %v322_v3 = vsel %vm225_vm0, %v914_v33, 0.0 }
  0xb9   : > { %v1298_v27 = vsub.f32 %v1198_v18, %v252_v58  ;;  %919 = vpow2.f32 %v302_v14  ;;  %v1314_v18 = vsub.f32 %v1195_v17, %v255_v57  ;;  %v916_v39 = vpop.eup %915 }
  0xba   : > { %v328_v46 = vsel %vm225_vm0, %v916_v39, 0.0 }
  0xbb   : > { %v306_v36 = vmul.f32 1.442695, %v1298_v27  ;;  %v308_v17 = vmul.f32 1.442695, %v1314_v18 }
  0xbc   : > { %v1261_v59 = vpop.xlane.xlu1 %260  ;;  %v258_v60 = vpop.xlane.xlu0 %257 }
  0xbd   : > { %921 = vpow2.f32 %v306_v36  ;;  %v1328_v42 = vsub.f32 %v1208_v22, %v258_v60  ;;  %v1343_v22 = vsub.f32 %v1205_v21, %v1261_v59  ;;  %v281_v21 = vsub.f32 %v1185_v13, %v1259_v55 }
  0xbe   : > { %923 = vpow2.f32 %v292_v41 }
  0xbf   : > { %v918_v44 = vpop.eup %917  ;;  %925 = vpow2.f32 %v308_v17  ;;  %v310_v50 = vmul.f32 1.442695, %v1328_v42  ;;  %v312_v57 = vmul.f32 1.442695, %v1343_v22  ;;  %v304_v63 = vmul.f32 1.442695, %v281_v21 }
  0xc0   : > { %v1264_v62 = vpop.xlane.xlu1 %266  ;;  %v1267_v5 = vpop.xlane.xlu0 %263  ;;  %v334_v52 = vsel %vm225_vm0, %v918_v44, 0.0  ;;  %927 = vpow2.f32 %v296_v49 }
  0xc1   : > { %929 = vpow2.f32 %v310_v50  ;;  %v1360_v58 = vsub.f32 %v1218_v26, %v1267_v5  ;;  %v1374_v26 = vsub.f32 %v1215_v25, %v1264_v62 }
  0xc2   : > { %931 = vpow2.f32 %v300_v56 }
  0xc3   : > { %v920_v53 = vpop.eup %919  ;;  %933 = vpow2.f32 %v312_v57 }
  0xc4   : > { %v1269_v7 = vpop.xlane.xlu1 %272  ;;  %v1274_v15 = vpop.xlane.xlu0 %269  ;;  %935 = vpow2.f32 %v304_v63 }
  0xc5   : > { %v1385_v25 = vsub.f32 %v1228_v30, %v1274_v15  ;;  %v1391_v14 = vsub.f32 %v1225_v29, %v1269_v7 }
  0xc7   : > { %v922_v13 = vpop.eup %921  ;;  %v320_v33 = vmul.f32 1.442695, %v1391_v14 }
  0xc8   : > { %v1276_v16 = vpop.permute.xlu1 %373  ;;  %v924_v5 = vpop.eup %923  ;;  %v346_v12 = vsel %vm225_vm0, %v922_v13, 0.0 }
  0xc9   : > { %vm420_vm1 = vcmp.eq.s32.totalorder %v1272_v11, %v1276_v16  ;;  %v926_v2 = vpop.eup %925 }
  0xca   : > { %v436_v10 = vsel %vm420_vm1, %v274_v61, 0.0  ;;  %v340_v61 = vsel %vm225_vm0, %v920_v53, 0.0  ;;  %v928_v62 = vpop.eup %927 }
  0xcb   : > { %v452_v19 = vsel %vm225_vm0, %v436_v10, 0.0  ;;  %v325_v10 = vsel %vm225_vm0, %v924_v5, 0.0 }
  0xcc   : > { %v1288_v23 = vpop.permute.xlu1 %379  ;;  %453 = vadd.xlane.f32.xlu0 %v452_v19  ;;  %v1290_v24 = vpop.permute.xlu0 %376  ;;  %v349_v19 = vsel %vm225_vm0, %v926_v2, 0.0 }
  0xcd   : > { %vm422_vm2 = vcmp.eq.s32.totalorder %v1272_v11, %v1288_v23  ;;  %vm421_vm3 = vcmp.eq.s32.totalorder %v1272_v11, %v1290_v24 }
  0xce   : > { %v438_v6 = vsel %vm422_vm2, %v276_v0, 0.0  ;;  %v437_v28 = vsel %vm421_vm3, %v275_v20, 0.0  ;;  %v314_v0 = vmul.f32 1.442695, %v1360_v58  ;;  %v930_v20 = vpop.eup %929 }
  0xcf   : > { %v458_v31 = vsel %vm225_vm0, %v438_v6, 0.0  ;;  %v455_v32 = vsel %vm225_vm0, %v437_v28, 0.0  ;;  %v318_v6 = vmul.f32 1.442695, %v1385_v25  ;;  %v932_v28 = vpop.eup %931  ;;  %v352_v30 = vsel %vm225_vm0, %v930_v20, 0.0 }
  0xd0   : > { %459 = vadd.xlane.f32.xlu1 %v458_v31  ;;  %v1309_v35 = vpop.permute.xlu1 %382  ;;  %456 = vadd.xlane.f32.xlu0 %v455_v32  ;;  %937 = vpow2.f32 %v314_v0  ;;  %v331_v31 = vsel %vm225_vm0, %v928_v62, 0.0  ;;  %v934_v15 = vpop.eup %933  ;;  %v337_v36 = vsel %vm225_vm0, %v932_v28, 0.0 }
  0xd1   : > { %vm423_vm4 = vcmp.eq.s32.totalorder %v1272_v11, %v1309_v35  ;;  %v355_v29 = vsel %vm225_vm0, %v934_v15, 0.0 }
  0xd2   : > { %v439_v37 = vsel %vm423_vm4, %v277_v34, 0.0  ;;  %v936_v34 = vpop.eup %935 }
  0xd3   : > { %v461_v38 = vsel %vm225_vm0, %v439_v37, 0.0 }
  0xd4   : > { %462 = vadd.xlane.f32.xlu1 %v461_v38  ;;  %v1322_v40 = vpop.permute.xlu1 %385  ;;  %323 = vadd.xlane.f32.xlu0 %v322_v3  ;;  %v343_v38 = vsel %vm225_vm0, %v936_v34, 0.0 }
  0xd5   : > { %vm424_vm5 = vcmp.eq.s32.totalorder %v1272_v11, %v1322_v40 }
  0xd6   : > { %v440_v43 = vsel %vm424_vm5, %v278_v8, 0.0 }
  0xd7   : > { %v464_v45 = vsel %vm225_vm0, %v440_v43, 0.0 }
  0xd8   : > { %v1337_v48 = vpop.permute.xlu1 %388  ;;  %465 = vadd.xlane.f32.xlu1 %v464_v45  ;;  %329 = vadd.xlane.f32.xlu0 %v328_v46  ;;  %v1422_v46 = vld [vmem:[%s1655_s2] ss:$0 sm:$0xff] }
  0xd9   : > { %vm425_vm6 = vcmp.eq.s32.totalorder %v1272_v11, %v1337_v48  ;;  %v507_v53 = vsel %vm421_vm3, %v1422_v46, 0.0  ;;  %v508_v24 = vsel %vm422_vm2, %v1422_v46, 0.0  ;;  %v509_v13 = vsel %vm423_vm4, %v1422_v46, 0.0 }
  0xda   : > { %v441_v9 = vsel %vm425_vm6, %v279_v47, 0.0  ;;  %v938_v7 = vpop.eup %937  ;;  %v531_v63 = vsel %vm225_vm0, %v509_v13, 0.0 }
  0xdb   : > { %v467_v51 = vsel %vm225_vm0, %v441_v9, 0.0  ;;  %v358_v3 = vsel %vm225_vm0, %v938_v7, 0.0  ;;  %v506_v9 = vsel %vm420_vm1, %v1422_v46, 0.0 }
  0xdc   : > { %v1351_v54 = vpop.permute.xlu1 %391  ;;  %468 = vadd.xlane.f32.xlu1 %v467_v51  ;;  %335 = vadd.xlane.f32.xlu0 %v334_v52  ;;  %v522_v51 = vsel %vm225_vm0, %v506_v9, 0.0 }
  0xdd   : > { %vm426_vm7 = vcmp.eq.s32.totalorder %v1272_v11, %v1351_v54 }
  0xde   : > { %v442_v59 = vsel %vm426_vm7, %v1281_v1, 0.0  ;;  %v316_v1 = vmul.f32 1.442695, %v1374_v26 }
  0xdf   : > { %v470_v60 = vsel %vm225_vm0, %v442_v59, 0.0 }
  0xe0   : > { %v1368_v55 = vpop.permute.xlu1 %394  ;;  %471 = vadd.xlane.f32.xlu1 %v470_v60  ;;  %341 = vadd.xlane.f32.xlu0 %v340_v61  ;;  %939 = vpow2.f32 %v316_v1  ;;  %v528_v60 = vsel %vm225_vm0, %v508_v24, 0.0 }
  0xe1   : > { %vm427_vm8 = vcmp.eq.s32.totalorder %v1272_v11, %v1368_v55  ;;  %941 = vpow2.f32 %v318_v6  ;;  %v512_v55 = vsel %vm426_vm7, %v1422_v46, 0.0 }
  0xe2   : > { %v443_v4 = vsel %vm427_vm8, %v281_v21, 0.0  ;;  %943 = vpow2.f32 %v320_v33  ;;  %v525_v21 = vsel %vm225_vm0, %v507_v53, 0.0  ;;  %v513_v1 = vsel %vm427_vm8, %v1422_v46, 0.0 }
  0xe3   : > { %v473_v8 = vsel %vm225_vm0, %v443_v4, 0.0  ;;  %v510_v4 = vsel %vm424_vm5, %v1422_v46, 0.0  ;;  %v543_v62 = vsel %vm225_vm0, %v513_v1, 0.0  ;;  %v540_v20 = vsel %vm225_vm0, %v512_v55, 0.0 }
  0xe4   : > { %474 = vadd.xlane.f32.xlu1 %v473_v8  ;;  %347 = vadd.xlane.f32.xlu0 %v346_v12  ;;  %v1396_v32 = vpop.permute.xlu1 %397  ;;  %v534_v5 = vsel %vm225_vm0, %v510_v4, 0.0  ;;  %v511_v12 = vsel %vm425_vm6, %v1422_v46, 0.0 }
  0xe5   : > { %vm428_vm9 = vcmp.eq.s32.totalorder %v1272_v11, %v1396_v32 }
  0xe6   : > { %v444_v41 = vsel %vm428_vm9, %v1298_v27, 0.0  ;;  %v1424_v27 = vpop.permute.xlu0 %403  ;;  %v514_v6 = vsel %vm428_vm9, %v1422_v46, 0.0 }
  0xe7   : > { %v476_v17 = vsel %vm225_vm0, %v444_v41, 0.0  ;;  %vm430_vm11 = vcmp.eq.s32.totalorder %v1272_v11, %v1424_v27  ;;  %v546_v54 = vsel %vm225_vm0, %v514_v6, 0.0 }
  0xe8   : > { %326 = vadd.xlane.f32.xlu1 %v325_v10  ;;  %350 = vadd.xlane.f32.xlu0 %v349_v19  ;;  %v1403_v37 = vpop.permute.xlu1 %400  ;;  %v446_v16 = vsel %vm430_vm11, %v1328_v42, 0.0 }
  0xe9   : > { %vm429_vm10 = vcmp.eq.s32.totalorder %v1272_v11, %v1403_v37  ;;  %v482_v57 = vsel %vm225_vm0, %v446_v16, 0.0 }
  0xea   : > { %v940_v39 = vpop.eup %939  ;;  %v445_v45 = vsel %vm429_vm10, %v1314_v18, 0.0  ;;  %v410_v56 = vpop.permute.xlu0 %409  ;;  %v515_v10 = vsel %vm429_vm10, %v1422_v46, 0.0 }
  0xeb   : > { %v361_v43 = vsel %vm225_vm0, %v940_v39, 0.0  ;;  %v942_v44 = vpop.eup %941  ;;  %v479_v47 = vsel %vm225_vm0, %v445_v45, 0.0  ;;  %vm432_vm13 = vcmp.eq.s32.totalorder %v1272_v11, %v410_v56  ;;  %v549_v19 = vsel %vm225_vm0, %v515_v10, 0.0 }
  0xec   : > { %332 = vadd.xlane.f32.xlu1 %v331_v31  ;;  %353 = vadd.xlane.f32.xlu0 %v352_v30  ;;  %v364_v49 = vsel %vm225_vm0, %v942_v44, 0.0  ;;  %v944_v50 = vpop.eup %943  ;;  %v407_v18 = vpop.permute.xlu1 %406  ;;  %v448_v23 = vsel %vm432_vm13, %v1360_v58, 0.0  ;;  %v516_v30 = vsel %vm430_vm11, %v1422_v46, 0.0  ;;  %v518_v34 = vsel %vm432_vm13, %v1422_v46, 0.0 }
  0xed   : > { %v367_v52 = vsel %vm225_vm0, %v944_v50, 0.0  ;;  %vm431_vm12 = vcmp.eq.s32.totalorder %v1272_v11, %v407_v18  ;;  %v488_v0 = vsel %vm225_vm0, %v448_v23, 0.0  ;;  %v552_v32 = vsel %vm225_vm0, %v516_v30, 0.0 }
  0xee   : > { %v447_v59 = vsel %vm431_vm12, %v1343_v22, 0.0  ;;  %v416_v22 = vpop.permute.xlu0 %415 }
  0xef   : > { %v485_v61 = vsel %vm225_vm0, %v447_v59, 0.0  ;;  %vm434_vm15 = vcmp.eq.s32.totalorder %v1272_v11, %v416_v22 }
  0xf0   : > { %338 = vadd.xlane.f32.xlu1 %v337_v36  ;;  %356 = vadd.xlane.f32.xlu0 %v355_v29  ;;  %v413_v42 = vpop.permute.xlu1 %412  ;;  %v450_v40 = vsel %vm434_vm15, %v1385_v25, 0.0  ;;  %v558_v29 = vsel %vm225_vm0, %v518_v34, 0.0  ;;  %v520_v7 = vsel %vm434_vm15, %v1422_v46, 0.0 }
  0xf1   : > { %vm433_vm14 = vcmp.eq.s32.totalorder %v1272_v11, %v413_v42  ;;  %v494_v2 = vsel %vm225_vm0, %v450_v40, 0.0  ;;  %v564_v37 = vsel %vm225_vm0, %v520_v7, 0.0 }
  0xf2   : > { %v449_v35 = vsel %vm433_vm14, %v1374_v26, 0.0  ;;  %v537_v26 = vsel %vm225_vm0, %v511_v12, 0.0  ;;  %v519_v31 = vsel %vm433_vm14, %v1422_v46, 0.0 }
  0xf3   : > { %v491_v8 = vsel %vm225_vm0, %v449_v35, 0.0  ;;  %v561_v15 = vsel %vm225_vm0, %v519_v31, 0.0 }
  0xf4   : > { %344 = vadd.xlane.f32.xlu1 %v343_v38  ;;  %359 = vadd.xlane.f32.xlu0 %v358_v3  ;;  %v419_v58 = vpop.permute.xlu1 %418 }
  0xf5   : > { %vm435_vm1 = vcmp.eq.s32.totalorder %v1272_v11, %v419_v58 }
  0xf6   : > { %v451_v48 = vsel %vm435_vm1, %v1391_v14, 0.0  ;;  %v517_v14 = vsel %vm431_vm12, %v1422_v46, 0.0  ;;  %v521_v33 = vsel %vm435_vm1, %v1422_v46, 0.0 }
  0xf7   : > { %v497_v25 = vsel %vm225_vm0, %v451_v48, 0.0  ;;  %v555_v28 = vsel %vm225_vm0, %v517_v14, 0.0  ;;  %v567_v36 = vsel %vm225_vm0, %v521_v33, 0.0 }
  0xf8   : > { %477 = vadd.xlane.f32.xlu1 %v476_v17  ;;  %362 = vadd.xlane.f32.xlu0 %v361_v43 }
  0xfc   : > { %480 = vadd.xlane.f32.xlu1 %v479_v47  ;;  %365 = vadd.xlane.f32.xlu0 %v364_v49 }
 0x100   : > { %523 = vadd.xlane.f32.xlu1 %v522_v51  ;;  %368 = vadd.xlane.f32.xlu0 %v367_v52 }
 0x104   : > { %526 = vadd.xlane.f32.xlu1 %v525_v21  ;;  %483 = vadd.xlane.f32.xlu0 %v482_v57 }
 0x108   : > { %529 = vadd.xlane.f32.xlu1 %v528_v60  ;;  %486 = vadd.xlane.f32.xlu0 %v485_v61 }
 0x10c   : > { %532 = vadd.xlane.f32.xlu1 %v531_v63  ;;  %489 = vadd.xlane.f32.xlu0 %v488_v0 }
 0x110   : > { %535 = vadd.xlane.f32.xlu1 %v534_v5  ;;  %492 = vadd.xlane.f32.xlu0 %v491_v8 }
 0x114   : > { %538 = vadd.xlane.f32.xlu1 %v537_v26  ;;  %495 = vadd.xlane.f32.xlu0 %v494_v2 }
 0x118   : > { %544 = vadd.xlane.f32.xlu1 %v543_v62  ;;  %498 = vadd.xlane.f32.xlu0 %v497_v25 }
 0x11c   : > { %550 = vadd.xlane.f32.xlu1 %v549_v19  ;;  %541 = vadd.xlane.f32.xlu0 %v540_v20 }
 0x120   : > { %556 = vadd.xlane.f32.xlu1 %v555_v28  ;;  %547 = vadd.xlane.f32.xlu0 %v546_v54 }
 0x124   : > { %562 = vadd.xlane.f32.xlu1 %v561_v15  ;;  %553 = vadd.xlane.f32.xlu0 %v552_v32 }
 0x128   : > { %568 = vadd.xlane.f32.xlu1 %v567_v36  ;;  %559 = vadd.xlane.f32.xlu0 %v558_v29 }
 0x12c   : > { %565 = vadd.xlane.f32.xlu0 %v564_v37 }
 0x159   : > { %v454_v38 = vpop.xlane.xlu0 %453 }
 0x15d   : > { %v460_v3 = vpop.xlane.xlu1 %459  ;;  %v457_v39 = vpop.xlane.xlu0 %456 }
 0x161   : > { %v463_v41 = vpop.xlane.xlu1 %462  ;;  %v324_v17 = vpop.xlane.xlu0 %323 }
 0x162   : > { %945 = vlog2.f32 %v324_v17 }
 0x165   : > { %v466_v43 = vpop.xlane.xlu1 %465  ;;  %v330_v44 = vpop.xlane.xlu0 %329 }
 0x166   : > { %947 = vlog2.f32 %v330_v44 }
 0x169   : > { %v469_v45 = vpop.xlane.xlu1 %468  ;;  %v336_v27 = vpop.xlane.xlu0 %335 }
 0x16a   : > { %949 = vlog2.f32 %v336_v27 }
 0x16c   : > { %v946_v47 = vpop.eup %945 }
 0x16d   : > { %v571_v49 = vmul.f32 0.6931472, %v946_v47  ;;  %v472_v50 = vpop.xlane.xlu1 %471  ;;  %v342_v9 = vpop.xlane.xlu0 %341 }
 0x16f   : > { %v1536_v11 = vsub.f32 %v454_v38, %v571_v49 }
 0x170   : > { %v948_v52 = vpop.eup %947 }
 0x171   : > { %v618_v46 = vmul.f32 1.442695, %v1536_v11  ;;  %v1539_v18 = vpop.xlane.xlu1 %474  ;;  %v348_v51 = vpop.xlane.xlu0 %347  ;;  %v575_v56 = vmul.f32 0.6931472, %v948_v52 }
 0x173   : > { %951 = vpow2.f32 %v618_v46  ;;  %v1541_v59 = vsub.f32 %v460_v3, %v575_v56 }
 0x174   : > { %v950_v24 = vpop.eup %949 }
 0x175   : > { %v327_v53 = vpop.xlane.xlu1 %326  ;;  %v351_v16 = vpop.xlane.xlu0 %350  ;;  %v579_v61 = vmul.f32 0.6931472, %v950_v24  ;;  %v622_v23 = vmul.f32 1.442695, %v1541_v59 }
 0x176   : > { %953 = vlog2.f32 %v327_v53 }
 0x177   : > { %955 = vlog2.f32 %v342_v9  ;;  %v1544_v35 = vsub.f32 %v466_v43, %v579_v61 }
 0x179   : > { %v333_v21 = vpop.xlane.xlu1 %332  ;;  %v354_v57 = vpop.xlane.xlu0 %353  ;;  %v626_v48 = vmul.f32 1.442695, %v1544_v35 }
 0x17a   : > { %957 = vlog2.f32 %v333_v21 }
 0x17d   : > { %v339_v42 = vpop.xlane.xlu1 %338  ;;  %v357_v60 = vpop.xlane.xlu0 %356 }
 0x17e   : > { %959 = vlog2.f32 %v339_v42  ;;  %v952_v13 = vpop.eup %951 }
 0x17f   : > { %v650_v58 = vsub.f32 1.0, %v952_v13 }
 0x180   : > { %v954_v22 = vpop.eup %953 }
 0x181   : > { %v573_v63 = vmul.f32 0.6931472, %v954_v22  ;;  %v345_v0 = vpop.xlane.xlu1 %344  ;;  %v360_v4 = vpop.xlane.xlu0 %359  ;;  %v666_v62 = vmax.f32 %v650_v58, 0.0 }
 0x182   : > { %961 = vlog2.f32 %v345_v0  ;;  %v956_v5 = vpop.eup %955 }
 0x183   : > { %963 = vpow2.f32 %v622_v23  ;;  %v1546_v8 = vsub.f32 %v457_v39, %v573_v63  ;;  %v583_v25 = vmul.f32 0.6931472, %v956_v5  ;;  %v698_v28 = vmul.f32 %v666_v62, %v666_v62 }
 0x184   : > { %v958_v12 = vpop.eup %957  ;;  %965 = vlog2.f32 %v348_v51 }
 0x185   : > { %v620_v40 = vmul.f32 1.442695, %v1546_v8  ;;  %v577_v26 = vmul.f32 0.6931472, %v958_v12  ;;  %v478_v2 = vpop.xlane.xlu1 %477  ;;  %v363_v1 = vpop.xlane.xlu0 %362  ;;  %v1555_v54 = vsub.f32 %v472_v50, %v583_v25  ;;  %v714_v37 = vmul.f32 %v698_v28, %v1536_v11 }
 0x187   : > { %967 = vpow2.f32 %v620_v40  ;;  %v1550_v10 = vsub.f32 %v463_v41, %v577_v26  ;;  %v630_v38 = vmul.f32 1.442695, %v1555_v54 }
 0x188   : > { %v960_v55 = vpop.eup %959  ;;  %969 = vlog2.f32 %v351_v16 }
 0x189   : > { %v624_v19 = vmul.f32 1.442695, %v1550_v10  ;;  %v581_v20 = vmul.f32 0.6931472, %v960_v55  ;;  %v481_v14 = vpop.xlane.xlu1 %480  ;;  %v1553_v6 = vpop.xlane.xlu0 %365  ;;  %971 = vpow2.f32 %v626_v48 }
 0x18b   : > { %973 = vpow2.f32 %v624_v19  ;;  %v1557_v31 = vsub.f32 %v469_v45, %v581_v20 }
 0x18c   : > { %v962_v30 = vpop.eup %961  ;;  %975 = vlog2.f32 %v354_v57 }
 0x18d   : > { %v964_v15 = vpop.eup %963  ;;  %v628_v32 = vmul.f32 1.442695, %v1557_v31  ;;  %v585_v33 = vmul.f32 0.6931472, %v962_v30  ;;  %v524_v34 = vpop.xlane.xlu1 %523 }
 0x18e   : > { %v369_v36 = vpop.xlane.xlu0 %368  ;;  %v966_v29 = vpop.eup %965  ;;  %v682_v7 = vsub.f32 0.0, %v524_v34  ;;  %v652_v41 = vsub.f32 1.0, %v964_v15 }
 0x18f   : > { %977 = vpow2.f32 %v628_v32  ;;  %v1563_v3 = vsub.f32 %v1539_v18, %v585_v33  ;;  %v587_v43 = vmul.f32 0.6931472, %v966_v29 }
 0x190   : > { %979 = vlog2.f32 %v357_v60  ;;  %v730_v39 = vmul.f32 %v714_v37, %v682_v7  ;;  %v668_v46 = vmax.f32 %v652_v41, 0.0 }
 0x191   : > { %v968_v17 = vpop.eup %967  ;;  %v527_v44 = vpop.xlane.xlu1 %526  ;;  %981 = vpow2.f32 %v630_v38  ;;  %v632_v49 = vmul.f32 1.442695, %v1563_v3  ;;  %v1566_v50 = vsub.f32 %v478_v2, %v587_v43 }
 0x192   : > { %v484_v45 = vpop.xlane.xlu0 %483  ;;  %v970_v27 = vpop.eup %969  ;;  %v651_v47 = vsub.f32 1.0, %v968_v17  ;;  %746 = vxpose.xlu0.b32.start [1/16] (narrow) %v730_v39, 8  ;;  %983 = vlog2.f32 %v360_v4  ;;  %v683_v42 = vsub.f32 0.0, %v527_v44  ;;  %v700_v61 = vmul.f32 %v668_v46, %v668_v46 }
 0x193   : > { %v972_v9 = vpop.eup %971  ;;  %v589_v51 = vmul.f32 0.6931472, %v970_v27  ;;  %985 = vlog2.f32 %v363_v1  ;;  %v634_v21 = vmul.f32 1.442695, %v1566_v50 }
 0x194   : > { %v667_v11 = vmax.f32 %v651_v47, 0.0  ;;  %987 = vpow2.f32 %v632_v49  ;;  %v654_v13 = vsub.f32 1.0, %v972_v9 }
 0x195   : > { %v974_v18 = vpop.eup %973  ;;  %v530_v52 = vpop.xlane.xlu1 %529  ;;  %v1569_v57 = vsub.f32 %v481_v14, %v589_v51  ;;  %989 = vpow2.f32 %v634_v21 }
 0x196   : > { %v487_v53 = vpop.xlane.xlu0 %486  ;;  %v976_v16 = vpop.eup %975  ;;  %v699_v56 = vmul.f32 %v667_v11, %v667_v11  ;;  %v653_v24 = vsub.f32 1.0, %v974_v18  ;;  %v684_v12 = vsub.f32 0.0, %v530_v52  ;;  %991 = vlog2.f32 %v1553_v6 }
 0x197   : > { %v591_v22 = vmul.f32 0.6931472, %v976_v16  ;;  %v636_v40 = vmul.f32 1.442695, %v1569_v57  ;;  %v670_v1 = vmax.f32 %v654_v13, 0.0  ;;  %993 = vlog2.f32 %v369_v36 }
 0x198   : > { %v715_v60 = vmul.f32 %v699_v56, %v1546_v8  ;;  %v669_v63 = vmax.f32 %v653_v24, 0.0  ;;  %v716_v8 = vmul.f32 %v700_v61, %v1541_v59 }
 0x199   : > { %v978_v23 = vpop.eup %977  ;;  %v533_v0 = vpop.xlane.xlu1 %532  ;;  %v1573_v26 = vsub.f32 %v484_v45, %v591_v22  ;;  %995 = vpow2.f32 %v636_v40  ;;  %v702_v59 = vmul.f32 %v670_v1, %v670_v1 }
 0x19a   : > { %v490_v4 = vpop.xlane.xlu0 %489  ;;  %v980_v58 = vpop.eup %979  ;;  %v731_v5 = vmul.f32 %v715_v60, %v683_v42  ;;  %v701_v2 = vmul.f32 %v669_v63, %v669_v63  ;;  %v655_v48 = vsub.f32 1.0, %v978_v23  ;;  %v732_v14 = vmul.f32 %v716_v8, %v684_v12 }
 0x19b   : > { %v982_v62 = vpop.eup %981  ;;  %v593_v25 = vmul.f32 0.6931472, %v980_v58  ;;  %v638_v30 = vmul.f32 1.442695, %v1573_v26  ;;  %v685_v32 = vsub.f32 0.0, %v533_v0  ;;  %v718_v43 = vmul.f32 %v702_v59, %v1544_v35 }
 0x19c   : > { %747 = vxpose.xlu0.b32.cont [2/16] (narrow) %v731_v5, 8  ;;  %v984_v20 = vpop.eup %983  ;;  %v717_v28 = vmul.f32 %v701_v2, %v1550_v10  ;;  %v671_v33 = vmax.f32 %v655_v48, 0.0  ;;  %v656_v34 = vsub.f32 1.0, %v982_v62 }
 0x19d   : > { %v536_v55 = vpop.xlane.xlu1 %535  ;;  %v1579_v15 = vsub.f32 %v487_v53, %v593_v25  ;;  %v986_v6 = vpop.eup %985  ;;  %v595_v7 = vmul.f32 0.6931472, %v984_v20  ;;  %997 = vpow2.f32 %v638_v30 }
 0x19e   : > { %v493_v19 = vpop.xlane.xlu0 %492  ;;  %v988_v29 = vpop.eup %987  ;;  %v733_v38 = vmul.f32 %v717_v28, %v685_v32  ;;  %v686_v39 = vsub.f32 0.0, %v536_v55  ;;  %v597_v41 = vmul.f32 0.6931472, %v986_v6  ;;  %v703_v44 = vmul.f32 %v671_v33, %v671_v33 }
 0x19f   : > { %v640_v36 = vmul.f32 1.442695, %v1579_v15  ;;  %v1582_v10 = vsub.f32 %v490_v4, %v595_v7  ;;  %v657_v45 = vsub.f32 1.0, %v988_v29  ;;  %v672_v27 = vmax.f32 %v656_v34, 0.0  ;;  %v990_v47 = vpop.eup %989 }
 0x1a0   : > { %748 = vxpose.xlu0.b32.cont [3/16] (narrow) %v732_v14, 8  ;;  %v1585_v49 = vsub.f32 %v493_v19, %v597_v41  ;;  %v992_v11 = vpop.eup %991  ;;  %v734_v46 = vmul.f32 %v718_v43, %v686_v39  ;;  %v658_v53 = vsub.f32 1.0, %v990_v47  ;;  %v719_v16 = vmul.f32 %v703_v44, %v1557_v31 }
 0x1a1   : > { %v539_v17 = vpop.xlane.xlu1 %538  ;;  %999 = vpow2.f32 %v640_v36  ;;  %v642_v51 = vmul.f32 1.442695, %v1582_v10  ;;  %v994_v52 = vpop.eup %993  ;;  %v673_v56 = vmax.f32 %v657_v45, 0.0  ;;  %v704_v35 = vmul.f32 %v672_v27, %v672_v27 }
 0x1a2   : > { %v496_v37 = vpop.xlane.xlu0 %495  ;;  %v687_v18 = vsub.f32 0.0, %v539_v17  ;;  %v644_v24 = vmul.f32 1.442695, %v1585_v49  ;;  %v599_v42 = vmul.f32 0.6931472, %v992_v11  ;;  %v674_v0 = vmax.f32 %v658_v53, 0.0 }
 0x1a3   : > { %v996_v21 = vpop.eup %995  ;;  %1001 = vpow2.f32 %v642_v51  ;;  %v601_v63 = vmul.f32 0.6931472, %v994_v52  ;;  %v705_v58 = vmul.f32 %v673_v56, %v673_v56  ;;  %v720_v31 = vmul.f32 %v704_v35, %v1555_v54 }
 0x1a4   : > { %749 = vxpose.xlu0.b32.cont [4/16] (narrow) %v733_v38, 8  ;;  %v735_v61 = vmul.f32 %v719_v16, %v687_v18  ;;  %v1590_v23 = vsub.f32 %v496_v37, %v599_v42  ;;  %v659_v4 = vsub.f32 1.0, %v996_v21  ;;  %1003 = vpow2.f32 %v644_v24 }
 0x1a5   : > { %v545_v22 = vpop.xlane.xlu1 %544  ;;  %v706_v48 = vmul.f32 %v674_v0, %v674_v0  ;;  %v721_v55 = vmul.f32 %v705_v58, %v1563_v3 }
 0x1a6   : > { %v499_v9 = vpop.xlane.xlu0 %498  ;;  %v689_v40 = vsub.f32 0.0, %v545_v22  ;;  %v646_v8 = vmul.f32 1.442695, %v1590_v23  ;;  %v675_v62 = vmax.f32 %v659_v4, 0.0 }
 0x1a7   : > { %v998_v5 = vpop.eup %997  ;;  %v1593_v12 = vsub.f32 %v499_v9, %v601_v63  ;;  %v722_v30 = vmul.f32 %v706_v48, %v1566_v50 }
 0x1a8   : > { %750 = vxpose.xlu0.b32.cont [5/16] (narrow) %v734_v46, 8  ;;  %v660_v25 = vsub.f32 1.0, %v998_v5  ;;  %v737_v54 = vmul.f32 %v721_v55, %v689_v40  ;;  %1005 = vpow2.f32 %v646_v8  ;;  %v707_v6 = vmul.f32 %v675_v62, %v675_v62 }
 0x1a9   : > { %v648_v20 = vmul.f32 1.442695, %v1593_v12  ;;  %v551_v28 = vpop.xlane.xlu1 %550 }
 0x1aa   : > { %v542_v60 = vpop.xlane.xlu0 %541  ;;  %v676_v32 = vmax.f32 %v660_v25, 0.0  ;;  %v691_v34 = vsub.f32 0.0, %v551_v28  ;;  %v723_v37 = vmul.f32 %v707_v6, %v1569_v57 }
 0x1ab   : > { %v688_v13 = vsub.f32 0.0, %v542_v60  ;;  %v1000_v19 = vpop.eup %999  ;;  %1007 = vpow2.f32 %v648_v20 }
 0x1ac   : > { %751 = vxpose.xlu0.b32.cont [6/16] (narrow) %v735_v61, 8  ;;  %v661_v59 = vsub.f32 1.0, %v1000_v19  ;;  %v708_v38 = vmul.f32 %v676_v32, %v676_v32  ;;  %v739_v17 = vmul.f32 %v723_v37, %v691_v34 }
 0x1ad   : > { %v736_v2 = vmul.f32 %v720_v31, %v688_v13  ;;  %v1002_v33 = vpop.eup %1001  ;;  %v557_v50 = vpop.xlane.xlu1 %556 }
 0x1ae   : > { %v548_v1 = vpop.xlane.xlu0 %547  ;;  %v1004_v7 = vpop.eup %1003  ;;  %v677_v39 = vmax.f32 %v661_v59, 0.0  ;;  %v662_v36 = vsub.f32 1.0, %v1002_v33  ;;  %v724_v44 = vmul.f32 %v708_v38, %v1573_v26  ;;  %v693_v11 = vsub.f32 0.0, %v557_v50 }
 0x1af   : > { %v690_v14 = vsub.f32 0.0, %v548_v1  ;;  %v663_v41 = vsub.f32 1.0, %v1004_v7 }
 0x1b0   : > { %752 = vxpose.xlu0.b32.cont [7/16] (narrow) %v736_v2, 8  ;;  %v709_v45 = vmul.f32 %v677_v39, %v677_v39  ;;  %v678_v27 = vmax.f32 %v662_v36, 0.0 }
 0x1b1   : > { %v738_v29 = vmul.f32 %v722_v30, %v690_v14  ;;  %v679_v9 = vmax.f32 %v663_v41, 0.0  ;;  %v563_v24 = vpop.xlane.xlu1 %562 }
 0x1b2   : > { %v554_v3 = vpop.xlane.xlu0 %553  ;;  %v1006_v47 = vpop.eup %1005  ;;  %v725_v57 = vmul.f32 %v709_v45, %v1579_v15  ;;  %v710_v52 = vmul.f32 %v678_v27, %v678_v27  ;;  %v695_v13 = vsub.f32 0.0, %v563_v24 }
 0x1b3   : > { %v692_v43 = vsub.f32 0.0, %v554_v3  ;;  %v664_v53 = vsub.f32 1.0, %v1006_v47  ;;  %v711_v16 = vmul.f32 %v679_v9, %v679_v9 }
 0x1b4   : > { %753 = vxpose.xlu0.b32.cont [8/16] (narrow) %v737_v54, 8  ;;  %v741_v35 = vmul.f32 %v725_v57, %v693_v11  ;;  %v726_v26 = vmul.f32 %v710_v52, %v1582_v10 }
 0x1b5   : > { %v740_v46 = vmul.f32 %v724_v44, %v692_v43  ;;  %v1008_v18 = vpop.eup %1007  ;;  %v680_v42 = vmax.f32 %v664_v53, 0.0  ;;  %v727_v60 = vmul.f32 %v711_v16, %v1585_v49  ;;  %v569_v5 = vpop.xlane.xlu1 %568 }
 0x1b6   : > { %v560_v51 = vpop.xlane.xlu0 %559  ;;  %v665_v56 = vsub.f32 1.0, %v1008_v18  ;;  %v697_v49 = vsub.f32 0.0, %v569_v5 }
 0x1b7   : > { %v694_v21 = vsub.f32 0.0, %v560_v51  ;;  %v712_v15 = vmul.f32 %v680_v42, %v680_v42  ;;  %v743_v4 = vmul.f32 %v727_v60, %v695_v13 }
 0x1b8   : > { %754 = vxpose.xlu0.b32.cont [9/16] (narrow) %v738_v29, 8  ;;  %v681_v61 = vmax.f32 %v665_v56, 0.0 }
 0x1b9   : > { %v742_v22 = vmul.f32 %v726_v26, %v694_v21  ;;  %v728_v31 = vmul.f32 %v712_v15, %v1590_v23 }
 0x1ba   : > { %v566_v63 = vpop.xlane.xlu0 %565  ;;  %v713_v0 = vmul.f32 %v681_v61, %v681_v61 }
 0x1bb   : > { %v696_v58 = vsub.f32 0.0, %v566_v63 }
 0x1bc   : > { %755 = vxpose.xlu0.b32.cont [10/16] (narrow) %v739_v17, 8  ;;  %v729_v10 = vmul.f32 %v713_v0, %v1593_v12 }
 0x1bd   : > { %v744_v40 = vmul.f32 %v728_v31, %v696_v58 }
 0x1be   : > { %v745_v2 = vmul.f32 %v729_v10, %v697_v49 }
 0x1c0   : > { %756 = vxpose.xlu0.b32.cont [11/16] (narrow) %v740_v46, 8 }
 0x1c4   : > { %757 = vxpose.xlu0.b32.cont [12/16] (narrow) %v741_v35, 8 }
 0x1c8   : > { %758 = vxpose.xlu0.b32.cont [13/16] (narrow) %v742_v22, 8 }
 0x1cc   : > { %759 = vxpose.xlu0.b32.cont [14/16] (narrow) %v743_v4, 8 }
 0x1d0   : > { %760 = vxpose.xlu0.b32.cont [15/16] (narrow) %v744_v40, 8 }
 0x1d4   : > { %761 = vxpose.xlu0.b32.end [16/16] (narrow) %v745_v2, 8 }
 0x218   : > { %v762_v23 = vpop.trf.xlu0 }
 0x219   : > { %778 = vst [vmem:[%s179_s9] sm:$0x1] %v762_v23 }
 0x21a   : > { %1022 = shalt.err (!%p1019_p3)
}
 0x21b   : > { %s1023_s24 = scalar_lea.hbm %s1613_s17, 16  ;;  %s1027_s30 = scalar_lea.hbm %s1656_s3, 32 }
 0x21c   : > { %p1024_p4 = scmp.ne.s32.totalorder %s1613_s17, %s1023_s24  ;;  %p1028_p9 = scmp.lt.u32.totalorder %s1613_s17, %s1656_s3 }
 0x21d   : > { %p1029_p10 = scmp.lt.u32.totalorder %s1027_s30, %s1023_s24  ;;  %p1031_p12 = scmp.lt.u32.totalorder %s1023_s24, %s1613_s17 }
 0x21e   : > { %p1025_p7 = pnand %p1024_p4, %p1130_p5 }
 0x21f   : > { %p1030_p11 = por %p1029_p10, %p1028_p9 }
 0x220   : > { %p1026_p8 = pneg %p1025_p7 }
 0x221   : > { %p1032_p13 = por %p1031_p12, %p1030_p11 }
 0x223   : > { %p1033_p0 = pnand %p1032_p13, %p1026_p8 }
 0x225   : > { %1036 = shalt.err (!%p1033_p0)
}
 0x226   : > { %871 = dma.vmem_to_hbm [thread:$0]  (%p1130_p5), %s1607_s10, 16, %s1613_s17, %s780_s19  }
 0x227 PF: > { %p877_p1 = scmp.ge.s32.totalorder %s1071_s15, 2  ;;  %s804_s6 = sand.u32 1, %s1059_s12  }
 0x228   : > { %s805_s7 = scalar_lea.sflag [#allocation3], %s804_s6 }
 0x229   : > { %p874_p2 = pnand %p877_p1, %p1134_p6 }
 0x22b   : > { %1054 = dma.done.wait (!%p874_p2), %s805_s7, 16  }
 0x22c   : > { %1056 = vsyncadd (!%p874_p2), %s805_s7, 4294967280  ;;  %p13_p3 = scmp.ge.s32.totalorder %s1118_s18, 4   ;;  %s1659_s12 = smov %s1063_s13 }
 0x22d   : > { %s1660_s13 = smov %s1067_s14  ;;  %s1661_s14 = smov %s1128_s21 }
 0x22e   : > { %s1662_s15 = smov %s1118_s18  ;;  %15 = sbr.rel (!%p13_p3) target bundleno = 3 (0x3), region = 70 }
 0x235   :  { %809 = vsyncpa [#allocation3], 1 }
 0x236   :  { %811 = vsyncpa [#allocation3 + $0x1], 1 }

</bundles_post_ra>
